<compile_context>
chip_gen: v7x
topology: tpu7x:2x2x1
jax: 0.10.0
libtpu: 0.0.40
codegen_flags: <defaults>
</compile_context>

<pallas_src>
import functools

import jax
import jax.numpy as jnp
from jax.experimental import pallas as pl
from jax.experimental.pallas import tpu as pltpu


def _round_up(n, m):
    return ((n + m - 1) // m) * m


def _cdiv(a, b):
    return (a + b - 1) // b


def _choose_fold(x_dim, y_dim, h2):
    # Fold F rows into the lane dim so F*y_dim >= 128 (lane-dense tail), while
    # keeping the replicated block-diagonal weights small (VMEM-resident).
    f = 1
    while f * y_dim < 128 and f < 128:
        f *= 2

    def w_bytes(ff):
        return 2 * (ff * x_dim) * (ff * 2 * h2) + 2 * (ff * 2 * h2) * (2 * ff * y_dim)

    while f > 1 and w_bytes(f) > 4 * 1024 * 1024:
        f //= 2
    return f


def _club_kernel(x_ref, d_ref, s_ref, w13_ref, b13_ref, w24_ref, b24_ref,
                 out_ref, acc_ref, *, fy):
    i = pl.program_id(1)

    @pl.when(i == 0)
    def _():
        acc_ref[...] = jnp.zeros_like(acc_ref)

    # Fused first layers of p_mu / p_logvar for F folded rows: one MXU call.
    h = jnp.dot(x_ref[...], w13_ref[...], preferred_element_type=jnp.float32)
    h = jnp.maximum(h + b13_ref[...], 0.0)

    # Fused second layers; columns arranged so the F mu blocks land in lanes
    # [0, fy) and the F logvar blocks in lanes [fy, 2*fy)  -> clean lane split.
    out2 = jnp.dot(h.astype(jnp.bfloat16), w24_ref[...],
                   preferred_element_type=jnp.float32) + b24_ref[...]
    mu = out2[:, :fy]                      # [tr, fy]
    logvar = jnp.tanh(out2[:, fy:])        # [tr, fy]
    inv_var = jnp.exp(-logvar)             # == 1 / exp(logvar)   (EUP)

    d = d_ref[...].astype(jnp.float32)     # y - y_shuffled  (folded)
    s = s_ref[...].astype(jnp.float32)     # y + y_shuffled  (folded)
    # positive - negative == inv_var * (y - ys) * (2*mu - y - ys)
    contrib = inv_var * d * (2.0 * mu - s)

    # Sublane-aligned partial reduction into the per-core accumulator
    # (pure VALU adds: (tr, fy) -> (8, fy)).
    tr = contrib.shape[0]
    acc_ref[...] += contrib.reshape(tr // 8, 8, fy).sum(axis=0)

    @pl.when(i == pl.num_programs(1) - 1)
    def _():
        out_ref[...] = acc_ref[...]


def club_sample_forward(x_samples, y_samples, params, perm_key, *,
                        block_rows=None, fold=None, n_cores=2):
    N, x_dim = x_samples.shape
    y_dim = y_samples.shape[1]
    (w1, b1, w2, b2, w3, b3, w4, b4) = params
    h2 = w1.shape[1]

    F = _choose_fold(x_dim, y_dim, h2) if fold is None else fold
    fx, fh, fy = F * x_dim, F * 2 * h2, F * y_dim

    # torch.randperm equivalent (deterministic via perm_key); row-level gather
    # stays as contiguous XLA glue on purpose.
    random_index = jax.random.permutation(perm_key, N)
    y_shuffled = y_samples[random_index]

    # d/s computed in f32 BEFORE the bf16 downcast (no cancellation error).
    d32 = y_samples.astype(jnp.float32) - y_shuffled.astype(jnp.float32)
    s32 = y_samples.astype(jnp.float32) + y_shuffled.astype(jnp.float32)

    # --- replicated block-diagonal weight fusion --------------------------
    w13 = jnp.concatenate([w1, w3], axis=1)                      # [x_dim, 2*h2]
    w13_big = jnp.zeros((fx, fh), jnp.float32)
    w24_big = jnp.zeros((fh, 2 * fy), jnp.float32)
    for f in range(F):
        w13_big = w13_big.at[f * x_dim:(f + 1) * x_dim,
                             f * 2 * h2:(f + 1) * 2 * h2].set(w13)
        w24_big = w24_big.at[f * 2 * h2: f * 2 * h2 + h2,
                             f * y_dim:(f + 1) * y_dim].set(w2)
        w24_big = w24_big.at[f * 2 * h2 + h2:(f + 1) * 2 * h2,
                             fy + f * y_dim: fy + (f + 1) * y_dim].set(w4)
    b13_big = jnp.tile(jnp.concatenate([b1, b3]), F).reshape(1, fh)
    b24_big = jnp.concatenate([jnp.tile(b2, F), jnp.tile(b4, F)]).reshape(1, 2 * fy)

    w13_big = w13_big.astype(jnp.bfloat16)
    w24_big = w24_big.astype(jnp.bfloat16)
    b13_big = b13_big.astype(jnp.float32)
    b24_big = b24_big.astype(jnp.float32)

    # --- fold F rows into the lane dim, pick row tile, pad -----------------
    n_fold = _cdiv(N, F)
    if block_rows is None:
        tr = min(4096, _round_up(_cdiv(n_fold, n_cores), 8))
    else:
        tr = _round_up(block_rows, 8)
    tr = max(tr, 8)
    # Cap the tile by a VMEM budget (double-buffered bf16 x + d + s streams).
    bytes_per_fold_row = 2 * (fx + 2 * fy)
    vmem_budget = 20 * 1024 * 1024
    tr_cap = max(8, ((vmem_budget // (2 * bytes_per_fold_row)) // 8) * 8)
    tr = min(tr, tr_cap)

    steps = max(1, _cdiv(n_fold, n_cores * tr))
    n_fold_pad = n_cores * steps * tr
    n_pad = n_fold_pad * F
    pad = n_pad - N

    xb = x_samples.astype(jnp.bfloat16)
    db = d32.astype(jnp.bfloat16)
    sb = s32.astype(jnp.bfloat16)
    if pad:
        # Padded rows contribute exactly 0: d == 0 there.
        xb = jnp.pad(xb, ((0, pad), (0, 0)))
        db = jnp.pad(db, ((0, pad), (0, 0)))
        sb = jnp.pad(sb, ((0, pad), (0, 0)))
    xb = xb.reshape(n_fold_pad, fx)
    db = db.reshape(n_fold_pad, fy)
    sb = sb.reshape(n_fold_pad, fy)

    grid = (n_cores, steps)
    kernel = functools.partial(_club_kernel, fy=fy)

    row = lambda c, i: (c * steps + i, 0)      # streamed per-tile, per-core
    const = lambda c, i: (0, 0)                # VMEM-resident across the grid

    cost = pl.CostEstimate(
        flops=2 * n_fold_pad * (fx * fh + fh * 2 * fy) + 8 * n_pad * y_dim,
        transcendentals=2 * n_pad * y_dim,
        bytes_accessed=(n_fold_pad * (fx + 2 * fy) * 2
                        + (w13_big.size + w24_big.size) * 2
                        + (b13_big.size + b24_big.size) * 4
                        + n_cores * 8 * fy * 4),
    )

    out = pl.pallas_call(
        kernel,
        out_shape=jax.ShapeDtypeStruct((n_cores * 8, fy), jnp.float32),
        grid=grid,
        in_specs=[
            pl.BlockSpec((tr, fx), row),
            pl.BlockSpec((tr, fy), row),
            pl.BlockSpec((tr, fy), row),
            pl.BlockSpec((fx, fh), const),
            pl.BlockSpec((1, fh), const),
            pl.BlockSpec((fh, 2 * fy), const),
            pl.BlockSpec((1, 2 * fy), const),
        ],
        out_specs=pl.BlockSpec((8, fy), lambda c, i: (c, 0)),
        scratch_shapes=[pltpu.VMEM((8, fy), jnp.float32)],
        compiler_params=pltpu.CompilerParams(
            dimension_semantics=("parallel", "arbitrary"),
            vmem_limit_bytes=32 * 1024 * 1024),
        cost_estimate=cost,
    )(xb, db, sb, w13_big, b13_big, w24_big, b24_big)

    # Sum per-core partial column sums; divide by 2*N (the TRUE N).
    return jnp.sum(out) / jnp.float32(2 * N)


def init_params(key, x_dim, y_dim, hidden_size):
    h2 = hidden_size // 2
    ks = jax.random.split(key, 8)
    scale = 0.1
    w1 = scale * jax.random.normal(ks[0], (x_dim, h2), jnp.float32)
    b1 = scale * jax.random.normal(ks[1], (h2,), jnp.float32)
    w2 = scale * jax.random.normal(ks[2], (h2, y_dim), jnp.float32)
    b2 = scale * jax.random.normal(ks[3], (y_dim,), jnp.float32)
    w3 = scale * jax.random.normal(ks[4], (x_dim, h2), jnp.float32)
    b3 = scale * jax.random.normal(ks[5], (h2,), jnp.float32)
    w4 = scale * jax.random.normal(ks[6], (h2, y_dim), jnp.float32)
    b4 = scale * jax.random.normal(ks[7], (y_dim,), jnp.float32)
    return (w1, b1, w2, b2, w3, b3, w4, b4)


def reference_forward(x, y, params, perm_key):
    # pure-JAX f32 reference matching CLUBSample.forward semantics
    (w1, b1, w2, b2, w3, b3, w4, b4) = params
    mu = jnp.maximum(x @ w1 + b1, 0.0) @ w2 + b2
    logvar = jnp.tanh(jnp.maximum(x @ w3 + b3, 0.0) @ w4 + b4)
    perm = jax.random.permutation(perm_key, x.shape[0])
    pos = -(mu - y) ** 2 / jnp.exp(logvar)
    neg = -(mu - y[perm]) ** 2 / jnp.exp(logvar)
    return jnp.mean(pos.sum(-1) - neg.sum(-1)) / 2.0


if __name__ == "__main__":
    x_dim, y_dim, hidden = 32, 16, 32

    key = jax.random.PRNGKey(0)
    k_x, k_y, k_p, k_perm, k_x2, k_y2, k_perm2 = jax.random.split(key, 7)
    params = init_params(k_p, x_dim, y_dim, hidden)

    # Small case (single grid step per core, heavy zero-padding path).
    N1 = 8
    x1 = jax.random.normal(k_x, (N1, x_dim), jnp.float32)
    y1 = jax.random.normal(k_y, (N1, y_dim), jnp.float32)
    out1 = jax.block_until_ready(club_sample_forward(x1, y1, params, k_perm))
    ref1 = reference_forward(x1, y1, params, k_perm)
    assert jnp.allclose(out1, ref1, atol=5e-2, rtol=5e-2), (out1, ref1)

    # Larger, non-divisible case (multi-step grid + accumulator + padding +
    # both "core" blocks of the parallel axis doing real work).
    N2 = 300
    x2 = jax.random.normal(k_x2, (N2, x_dim), jnp.float32)
    y2 = jax.random.normal(k_y2, (N2, y_dim), jnp.float32)
    out2 = jax.block_until_ready(
        club_sample_forward(x2, y2, params, k_perm2, block_rows=8))
    ref2 = reference_forward(x2, y2, params, k_perm2)
    assert jnp.allclose(out2, ref2, atol=5e-2, rtol=5e-2), (out2, ref2)

    print("KERNEL_OK")
</pallas_src>

<mosaic_0001>
module attributes {stable_mosaic.version = 11 : i64} {
  func.func @_club_kernel(%arg0: i32, %arg1: i32, %arg2: memref<8x256xbf16, #tpu.memory_space<vmem>>, %arg3: memref<8x128xbf16, #tpu.memory_space<vmem>>, %arg4: memref<8x128xbf16, #tpu.memory_space<vmem>>, %arg5: memref<256x256xbf16, #tpu.memory_space<vmem>>, %arg6: memref<1x256xf32, #tpu.memory_space<vmem>>, %arg7: memref<256x256xbf16, #tpu.memory_space<vmem>>, %arg8: memref<1x256xf32, #tpu.memory_space<vmem>>, %arg9: memref<8x128xf32, #tpu.memory_space<vmem>>, %arg10: memref<8x128xf32, #tpu.memory_space<vmem>>) attributes {dimension_semantics = [#tpu.dimension_semantics<parallel>, #tpu.dimension_semantics<arbitrary>], iteration_bounds = array<i64: 2, 1>, scalar_prefetch = 0 : i64, scratch_operands = 1 : i64, tpu.core_type = #tpu.core_type<tc>, window_params = [{transform_indices = @transform_0, window_bounds = array<i64: 8, 256>}, {transform_indices = @transform_1, window_bounds = array<i64: 8, 128>}, {transform_indices = @transform_2, window_bounds = array<i64: 8, 128>}, {pipeline_mode = #tpu.pipeline_mode<synchronous>, transform_indices = @transform_3, window_bounds = array<i64: 256, 256>}, {pipeline_mode = #tpu.pipeline_mode<synchronous>, transform_indices = @transform_4, window_bounds = array<i64: 1, 256>}, {pipeline_mode = #tpu.pipeline_mode<synchronous>, transform_indices = @transform_5, window_bounds = array<i64: 256, 256>}, {pipeline_mode = #tpu.pipeline_mode<synchronous>, transform_indices = @transform_6, window_bounds = array<i64: 1, 256>}, {transform_indices = @transform_7, window_bounds = array<i64: 8, 128>}]} {
    %c0_i32 = arith.constant 0 : i32
    %0 = arith.cmpi eq, %arg1, %c0_i32 : i32
    %1 = arith.extui %0 : i1 to i32
    %c0_i32_0 = arith.constant 0 : i32
    %2 = arith.cmpi ne, %1, %c0_i32_0 : i32
    scf.if %2 {
      %cst_25 = arith.constant 0.000000e+00 : f32
      %40 = vector.broadcast %cst_25 : f32 to vector<8x128xf32>
      %c0_26 = arith.constant 0 : index
      %c0_27 = arith.constant 0 : index
      %41 = vector.load %arg10[%c0_26, %c0_27] : memref<8x128xf32, #tpu.memory_space<vmem>>, vector<8x128xf32>
      tpu.vector_store %arg10[%c0_26, %c0_27], %40 {strides = array<i32>} : memref<8x128xf32, #tpu.memory_space<vmem>>, vector<8x128xf32>,
    } else {
    }
    %c0 = arith.constant 0 : index
    %c0_1 = arith.constant 0 : index
    %3 = vector.load %arg2[%c0, %c0_1] : memref<8x256xbf16, #tpu.memory_space<vmem>>, vector<8x256xbf16>
    %c0_2 = arith.constant 0 : index
    %c0_3 = arith.constant 0 : index
    %4 = vector.load %arg5[%c0_2, %c0_3] : memref<256x256xbf16, #tpu.memory_space<vmem>>, vector<256x256xbf16>
    %cst = arith.constant dense<0.000000e+00> : vector<8x256xf32>
    %5 = tpu.matmul %3, %4, %cst {dimension_numbers = #tpu.dot_dimension_numbers<[1], [0], [0], [1], [0, 0, 1, 1], [], []>} : vector<8x256xbf16>, vector<256x256xbf16>, vector<8x256xf32> -> vector<8x256xf32>
    %c0_4 = arith.constant 0 : index
    %c0_5 = arith.constant 0 : index
    %6 = vector.load %arg6[%c0_4, %c0_5] : memref<1x256xf32, #tpu.memory_space<vmem>>, vector<1x256xf32>
    %7 = vector.broadcast %6 : vector<1x256xf32> to vector<8x256xf32>
    %8 = arith.addf %5, %7 : vector<8x256xf32>
    %cst_6 = arith.constant 0.000000e+00 : f32
    %9 = vector.broadcast %cst_6 : f32 to vector<8x256xf32>
    %10 = arith.maximumf %8, %9 : vector<8x256xf32>
    %11 = arith.truncf %10 : vector<8x256xf32> to vector<8x256xbf16>
    %c0_7 = arith.constant 0 : index
    %c0_8 = arith.constant 0 : index
    %12 = vector.load %arg7[%c0_7, %c0_8] : memref<256x256xbf16, #tpu.memory_space<vmem>>, vector<256x256xbf16>
    %cst_9 = arith.constant dense<0.000000e+00> : vector<8x256xf32>
    %13 = tpu.matmul %11, %12, %cst_9 {dimension_numbers = #tpu.dot_dimension_numbers<[1], [0], [0], [1], [0, 0, 1, 1], [], []>} : vector<8x256xbf16>, vector<256x256xbf16>, vector<8x256xf32> -> vector<8x256xf32>
    %c0_10 = arith.constant 0 : index
    %c0_11 = arith.constant 0 : index
    %14 = vector.load %arg8[%c0_10, %c0_11] : memref<1x256xf32, #tpu.memory_space<vmem>>, vector<1x256xf32>
    %15 = vector.broadcast %14 : vector<1x256xf32> to vector<8x256xf32>
    %16 = arith.addf %13, %15 : vector<8x256xf32>
    %17 = vector.extract_strided_slice %16 {offsets = [0, 0], sizes = [8, 128], strides = [1, 1]} : vector<8x256xf32> to vector<8x128xf32>
    %18 = vector.extract_strided_slice %16 {offsets = [0, 128], sizes = [8, 128], strides = [1, 1]} : vector<8x256xf32> to vector<8x128xf32>
    %19 = math.tanh %18 : vector<8x128xf32>
    %cst_12 = arith.constant 0.000000e+00 : f32
    %20 = vector.broadcast %cst_12 : f32 to vector<8x128xf32>
    %21 = arith.subf %20, %19 : vector<8x128xf32>
    %22 = math.exp %21 : vector<8x128xf32>
    %c0_13 = arith.constant 0 : index
    %c0_14 = arith.constant 0 : index
    %23 = vector.load %arg3[%c0_13, %c0_14] : memref<8x128xbf16, #tpu.memory_space<vmem>>, vector<8x128xbf16>
    %24 = arith.extf %23 : vector<8x128xbf16> to vector<8x128xf32>
    %c0_15 = arith.constant 0 : index
    %c0_16 = arith.constant 0 : index
    %25 = vector.load %arg4[%c0_15, %c0_16] : memref<8x128xbf16, #tpu.memory_space<vmem>>, vector<8x128xbf16>
    %26 = arith.extf %25 : vector<8x128xbf16> to vector<8x128xf32>
    %27 = arith.mulf %22, %24 : vector<8x128xf32>
    %cst_17 = arith.constant 2.000000e+00 : f32
    %28 = vector.broadcast %cst_17 : f32 to vector<8x128xf32>
    %29 = arith.mulf %28, %17 : vector<8x128xf32>
    %30 = arith.subf %29, %26 : vector<8x128xf32>
    %31 = arith.mulf %27, %30 : vector<8x128xf32>
    %c0_18 = arith.constant 0 : index
    %c0_19 = arith.constant 0 : index
    %32 = vector.load %arg10[%c0_18, %c0_19] : memref<8x128xf32, #tpu.memory_space<vmem>>, vector<8x128xf32>
    %33 = vector.shape_cast %31 : vector<8x128xf32> to vector<1x8x128xf32>
    %cst_20 = arith.constant dense<0.000000e+00> : vector<8x128xf32>
    %34 = vector.multi_reduction <add>, %33, %cst_20 [0] : vector<1x8x128xf32> to vector<8x128xf32>
    %35 = arith.addf %32, %34 : vector<8x128xf32>
    %c0_21 = arith.constant 0 : index
    %c0_22 = arith.constant 0 : index
    %36 = vector.load %arg10[%c0_21, %c0_22] : memref<8x128xf32, #tpu.memory_space<vmem>>, vector<8x128xf32>
    tpu.vector_store %arg10[%c0_21, %c0_22], %35 {strides = array<i32>} : memref<8x128xf32, #tpu.memory_space<vmem>>, vector<8x128xf32>,
    %c0_i32_23 = arith.constant 0 : i32
    %37 = arith.cmpi eq, %arg1, %c0_i32_23 : i32
    %38 = arith.extui %37 : i1 to i32
    %c0_i32_24 = arith.constant 0 : i32
    %39 = arith.cmpi ne, %38, %c0_i32_24 : i32
    scf.if %39 {
      %c0_25 = arith.constant 0 : index
      %c0_26 = arith.constant 0 : index
      %40 = vector.load %arg10[%c0_25, %c0_26] : memref<8x128xf32, #tpu.memory_space<vmem>>, vector<8x128xf32>
      %c0_27 = arith.constant 0 : index
      %c0_28 = arith.constant 0 : index
      %41 = vector.load %arg9[%c0_27, %c0_28] : memref<8x128xf32, #tpu.memory_space<vmem>>, vector<8x128xf32>
      tpu.vector_store %arg9[%c0_27, %c0_28], %40 {strides = array<i32>} : memref<8x128xf32, #tpu.memory_space<vmem>>, vector<8x128xf32>,
    } else {
    }
    return
  }
  func.func @transform_0(%arg0: i32, %arg1: i32) -> (i32, i32) {
    %c1_i32 = arith.constant 1 : i32
    %0 = arith.muli %arg0, %c1_i32 : i32
    %1 = arith.addi %0, %arg1 : i32
    %c0_i32 = arith.constant 0 : i32
    %c0_i32_0 = arith.constant 0 : i32
    return %1, %c0_i32 : i32, i32
  }
  func.func @transform_1(%arg0: i32, %arg1: i32) -> (i32, i32) {
    %c1_i32 = arith.constant 1 : i32
    %0 = arith.muli %arg0, %c1_i32 : i32
    %1 = arith.addi %0, %arg1 : i32
    %c0_i32 = arith.constant 0 : i32
    %c0_i32_0 = arith.constant 0 : i32
    return %1, %c0_i32 : i32, i32
  }
  func.func @transform_2(%arg0: i32, %arg1: i32) -> (i32, i32) {
    %c1_i32 = arith.constant 1 : i32
    %0 = arith.muli %arg0, %c1_i32 : i32
    %1 = arith.addi %0, %arg1 : i32
    %c0_i32 = arith.constant 0 : i32
    %c0_i32_0 = arith.constant 0 : i32
    return %1, %c0_i32 : i32, i32
  }
  func.func @transform_3(%arg0: i32, %arg1: i32) -> (i32, i32) {
    %c0_i32 = arith.constant 0 : i32
    %c0_i32_0 = arith.constant 0 : i32
    %c0_i32_1 = arith.constant 0 : i32
    return %c0_i32, %c0_i32_0 : i32, i32
  }
  func.func @transform_4(%arg0: i32, %arg1: i32) -> (i32, i32) {
    %c0_i32 = arith.constant 0 : i32
    %c0_i32_0 = arith.constant 0 : i32
    %c0_i32_1 = arith.constant 0 : i32
    return %c0_i32, %c0_i32_0 : i32, i32
  }
  func.func @transform_5(%arg0: i32, %arg1: i32) -> (i32, i32) {
    %c0_i32 = arith.constant 0 : i32
    %c0_i32_0 = arith.constant 0 : i32
    %c0_i32_1 = arith.constant 0 : i32
    return %c0_i32, %c0_i32_0 : i32, i32
  }
  func.func @transform_6(%arg0: i32, %arg1: i32) -> (i32, i32) {
    %c0_i32 = arith.constant 0 : i32
    %c0_i32_0 = arith.constant 0 : i32
    %c0_i32_1 = arith.constant 0 : i32
    return %c0_i32, %c0_i32_0 : i32, i32
  }
  func.func @transform_7(%arg0: i32, %arg1: i32) -> (i32, i32) {
    %c0_i32 = arith.constant 0 : i32
    %c0_i32_0 = arith.constant 0 : i32
    return %arg0, %c0_i32 : i32, i32
  }
}

</mosaic_0001>

<bundles_post_ra>
// kernel: tpu_custom_call.1
= control target key start
LH: loop header
LB: loop body
LE: loop exit
PB: predicated region body
PF: predicated region fallthrough
CT: control target
= control target key end

     0   :  { %s2006_s0 = inlined_call_operand.hbm [shape: bf16[16,256], index: 0, kind: input, shape index: {}]   ;;  %s2007_s1 = inlined_call_operand.hbm [shape: bf16[16,128], index: 1, kind: input, shape index: {}]   ;;  %s2008_s2 = inlined_call_operand.hbm [shape: bf16[16,128], index: 2, kind: input, shape index: {}]   ;;  %s2009_s3 = inlined_call_operand.hbm [shape: bf16[256,256], index: 3, kind: input, shape index: {}]   ;;  %s2010_s4 = inlined_call_operand.vmem [shape: f32[1,256], index: 4, kind: input, shape index: {}]   ;;  %s2011_s5 = inlined_call_operand.hbm [shape: bf16[256,256], index: 5, kind: input, shape index: {}]   ;;  %s2012_s6 = inlined_call_operand.vmem [shape: f32[1,256], index: 6, kind: input, shape index: {}]   ;;  %s2013_s7 = inlined_call_operand.hbm [shape: f32[16,128], index: 7, kind: output, shape index: {}]  }
   0x1   :  { %2035 = sst [smem:[#allocation23_spill]] %s2007_s1 }
   0x2   :  { %2036 = sst [smem:[#allocation24_spill]] %s2009_s3 }
   0x3   :  { %2037 = sst [smem:[#allocation25_spill]] %s2013_s7 }
   0x4   :  { %12 = vsyncpa [#allocation4], 0 }
   0x5   :  { %14 = vsyncpa [#allocation4 + $0x1], 0 }
   0x6   :  { %15 = vsyncpa [#allocation7], 0 }
   0x7   :  { %17 = vsyncpa [#allocation7 + $0x1], 0 }
   0x8   :  { %18 = vsyncpa [#allocation10], 0 }
   0x9   :  { %19 = vsyncpa [#allocation5], 0 }
   0xa   :  { %21 = vsyncpa [#allocation5 + $0x1], 0  ;;  %s1678_s24 = smov 0   ;;  %s1680_s25 = smov 0  }
   0xb   :  { %s1682_s26 = smov 0   ;;  %s1684_s27 = smov 0  }
   0xc   :  { %s1686_s28 = smov 0   ;;  %s1688_s29 = smov 0  }
   0xd LB: > { %2038 = sst [smem:[#allocation17_spill]] %s1608_s24  ;;  %s1709_s30 = sadd.s32 4294967295, %s1628_s29   ;;  %s1628_s29 = sphi %s1688_s29, %s27_s29   ;;  %s1624_s28 = sphi %s1686_s28, %s2081_s28   ;;  %s1620_s27 = sphi %s1684_s27, %s2080_s27   ;;  %s1616_s26 = sphi %s1682_s26, %s2079_s26   ;;  %s1612_s25 = sphi %s1680_s25, %s2078_s25   ;;  %s1608_s24 = sphi %s1678_s24, %s2077_s24  }
   0xe   : > { %2039 = sst [smem:[#allocation18_spill]] %s1616_s26  ;;  %s1105_s8 = sadd.s32 4294967294, %s1628_s29  }
   0xf   : > { %2040 = sst [smem:[#allocation19_spill]] %s1628_s29  ;;  %p61_p0 = scmp.ne.s32.totalorder %s1612_s25, %s1608_s24 }
  0x10   : > { %p2014_p1 = scmp.eq.s32.totalorder %s1709_s30, 0  ;;  %p231_p3 = scmp.eq.s32.totalorder %s1105_s8, 1 }
  0x11   : > { %p1106_p5 = scmp.ge.s32.totalorder %s1628_s29, 1  ;;  %p238_p7 = scmp.lt.s32.totalorder %s1628_s29, 3 }
  0x12   : > { %p1718_p4 = por %p2014_p1, %p61_p0  ;;  %p1723_p6 = por %p231_p3, %p61_p0 }
  0x13   : > { %p1728_p8 = pnand %p1106_p5, %p238_p7  ;;  %s1630_s12 = smov [#allocation9]  }
  0x14   : > { %s2041_s9 = scalar_select %p1718_p4, 1, 0 }
  0x15   : > { %s2042_s10 = scalar_select %p1723_p6, 1, 0 }
  0x16   : > { %s2044_s11 = scalar_select %p1728_p8, 1, 0 }
  0x17   : > { %2043 = sst [smem:[#allocation20_spill]] %s2042_s10  ;;  %s250_s13 = sshll.u32 %s1630_s12, 4  ;;  %s251_s13 = int_to_ptr.vmem [resolvable:$true] %s250_s13 }
  0x18   : > { %p1211_p9 = pneg %p1728_p8  ;;  %s39_s15 = sadd.s32 1, %s1624_s28 }
  0x19   : > { %s2046_s3 = sld [smem:[#allocation24_spill]] }
  0x1a   : > { %p1737_p11 = pnand %p1211_p9, %p2014_p1 }
  0x1c   : > { %s2045_s14 = scalar_select %p1737_p11, 1, 0 }
  0x1d   : > { %p2025_p13 = pneg %p1737_p11 }
  0x1f   : > { %s1392_s18 = scalar_lea.hbm %s2046_s3, 4096 }
  0x20   : > { %p1393_p12 = scmp.ne.s32.totalorder %s2046_s3, %s1392_s18  ;;  %p1399_p5 = scmp.lt.u32.totalorder %s1392_s18, %s2046_s3 }
  0x22   : > { %p1395_p0 = pnand %p2025_p13, %p1393_p12 }
  0x24   : > { %p1396_p3 = pneg %p1395_p0 }
  0x26   : > { %p1401_p7 = pnand %p1399_p5, %p1396_p3 }
  0x28   : > { %1404 = shalt.err (!%p1401_p7)
}
  0x29   : > { %s1405_s23 = scalar_lea.vmem %s251_s13, 4096  ;;  %p1413_p2 = scmp.lt.s32.totalorder %s251_s13, %s251_s13 }
  0x2a   : > { %p1406_p9 = scmp.ne.s32.totalorder %s251_s13, %s1405_s23  ;;  %p1414_p6 = scmp.lt.s32.totalorder %s1405_s23, %s1405_s23 }
  0x2c   : > { %p1408_p10 = pnand %p1406_p9, %p2025_p13  ;;  %p1415_p4 = por %p1414_p6, %p1413_p2 }
  0x2e   : > { %p1409_p1 = pneg %p1408_p10 }
  0x30   : > { %p1416_p8 = pnand %p1415_p4, %p1409_p1 }
  0x32   : > { %1419 = shalt.err (!%p1416_p8)
}
  0x33   : > { %s2017_s8 = smov 128   ;;  %s2018_s12 = smov 8  }
  0x34   : > { %1214 = dma.hbm_to_vmem [thread:$0]  (!%p1737_p11), %s2046_s3, 4096, %s251_s13, [#allocation10], %s2017_s8, %s2017_s8, %s2018_s12  }
  0x35   : > { %p41_p1 = scmp.ge.s32.totalorder %s39_s15, 2  ;;  %s48_s18 = sadd.s32 1, %s1616_s26 }
  0x36   : > { %p55_p2 = scmp.ne.s32.totalorder %s1616_s26, %s1612_s25  ;;  %p56_p4 = scmp.eq.s32.totalorder %s1628_s29, 0 }
  0x37   : > { %s2083_s15 = smov (%p41_p1, %s39_s15), 0  ;;  %p2048_p8 = scmp.eq.s32.totalorder %s1709_s30, 1 }
  0x38   : > { %2047 = sst [smem:[#allocation21_spill]] %s2083_s15  ;;  %p57_p6 = por %p56_p4, %p55_p2 }
  0x39   : > { %p1775_p10 = por %p2048_p8, %p55_p2  ;;  %s45_s20 = ssub.s32 %s1624_s28, %s2083_s15 }
  0x3a   : > { %p1234_p12 = scmp.lt.s32.totalorder %s1628_s29, 2  ;;  %p46_p0 = scmp.eq.s32.totalorder %s45_s20, 0 }
  0x3b   : > { %s2049_s19 = scalar_select %p1775_p10, 1, 0 }
  0x3c   : > { %s1783_s21 = sand.u32 1, %s1616_s26   ;;  %p1785_p3 = pnand %p1234_p12, %p57_p6 }
  0x3d   : > { %s303_s22 = sand.u32 1, %s1628_s29   ;;  %s2024_s16 = sshll.u32 %s1783_s21, 2 }
  0x3e   : > { %s2050_s13 = scalar_select %p1785_p3, 1, 0 }
  0x3f   : > { %s1791_s23 = scalar_select %p46_p0, %s1616_s26, %s48_s18  }
  0x40   : > { %s1114_s17 = sshll.u32 %s1624_s28, 6  ;;  %s2052_s1 = sld [smem:[#allocation23_spill]] }
  0x41   : > { %2051 = sst [smem:[#allocation22_spill]] %s1791_s23  ;;  %s307_s20 = scalar_lea.vmem [#allocation6], %s2024_s16 }
  0x42   : > { %s315_s15 = sshll.u32 %s307_s20, 4  ;;  %s1807_s18 = scalar_lea.hbm %s2008_s2, %s1114_s17  ;;  %s1802_s15 = int_to_ptr.vmem [resolvable:$true] %s315_s15 }
  0x43   : > { %s1809_s23 = scalar_lea.sflag [#allocation7], %s303_s22  ;;  %p1815_p7 = pneg %p1785_p3 }
  0x45   : > { %s2053_s8 = scalar_select %p1815_p7, 1, 0 }
  0x46   : > { %s1798_s3 = scalar_lea.hbm %s2052_s1, %s1114_s17  ;;  %s1425_s16 = scalar_lea.hbm %s2052_s1, 128 }
  0x47   : > { %s1420_s26 = scalar_lea.hbm %s1798_s3, 64  ;;  %p1426_p2 = scmp.lt.u32.totalorder %s1798_s3, %s2052_s1 }
  0x48   : > { %p1421_p5 = scmp.ne.s32.totalorder %s1798_s3, %s1420_s26  ;;  %p1427_p4 = scmp.lt.u32.totalorder %s1425_s16, %s1420_s26 }
  0x49   : > { %p1429_p8 = scmp.lt.u32.totalorder %s1420_s26, %s1798_s3 }
  0x4a   : > { %p1423_p9 = pnand %p1815_p7, %p1421_p5  ;;  %p1428_p6 = por %p1427_p4, %p1426_p2 }
  0x4c   : > { %p1424_p1 = pneg %p1423_p9  ;;  %p1430_p12 = por %p1429_p8, %p1428_p6 }
  0x4e   : > { %p1431_p0 = pnand %p1430_p12, %p1424_p1 }
  0x50   : > { %1434 = shalt.err (!%p1431_p0)
}
  0x51   : > { %s1435_s22 = scalar_lea.vmem %s1802_s15, 64  ;;  %s1633_s17 = smov [#allocation6]  }
  0x52   : > { %p1436_p5 = scmp.ne.s32.totalorder %s1802_s15, %s1435_s22  ;;  %s1440_s12 = sshll.u32 %s1633_s17, 4  ;;  %s1441_s12 = int_to_ptr.vmem [resolvable:$false] %s1440_s12 }
  0x53   : > { %s1442_s20 = scalar_lea.vmem %s1441_s12, 128  ;;  %p1443_p10 = scmp.lt.s32.totalorder %s1802_s15, %s1441_s12 }
  0x54   : > { %p1438_p9 = pnand %p1436_p5, %p1815_p7  ;;  %p1444_p11 = scmp.lt.s32.totalorder %s1442_s20, %s1435_s22 }
  0x56   : > { %p1439_p13 = pneg %p1438_p9  ;;  %p1445_p2 = por %p1444_p11, %p1443_p10 }
  0x58   : > { %p1446_p4 = pnand %p1445_p2, %p1439_p13 }
  0x5a   : > { %1449 = shalt.err (!%p1446_p4)
}
  0x5b   : > { %1224 = dma.hbm_to_vmem [thread:$0]  (!%p1785_p3), %s1798_s3, 64, %s1802_s15, %s1809_s23  }
  0x5c   : > { %s1634_s26 = smov [#allocation11]   ;;  %s1110_s29 = sshll.u32 %s1783_s21, 3 }
  0x5d   : > { %s266_s16 = sshll.u32 %s1634_s26, 4  ;;  %s1450_s12 = scalar_lea.hbm %s2011_s5, 4096  ;;  %s267_s16 = int_to_ptr.vmem [resolvable:$true] %s266_s16 }
  0x5e   : > { %p1451_p11 = scmp.ne.s32.totalorder %s2011_s5, %s1450_s12  ;;  %p2054_p13 = scmp.ne.s32.totalorder %s2045_s14, 0 }
  0x5f   : > { %p1457_p8 = scmp.lt.u32.totalorder %s1450_s12, %s2011_s5 }
  0x60   : > { %p2055_p10 = pneg %p2054_p13 }
  0x62   : > { %p1453_p1 = pnand %p1451_p11, %p2055_p10 }
  0x64   : > { %p1454_p6 = pneg %p1453_p1 }
  0x66   : > { %p1459_p12 = pnand %p1457_p8, %p1454_p6 }
  0x68   : > { %1462 = shalt.err (!%p1459_p12)
}
  0x69   : > { %s1463_s3 = scalar_lea.vmem %s267_s16, 4096  ;;  %p2056_p5 = pmov %p2055_p10 }
  0x6a   : > { %p1464_p0 = scmp.ne.s32.totalorder %s267_s16, %s1463_s3  ;;  %p1471_p4 = scmp.lt.s32.totalorder %s267_s16, %s267_s16 }
  0x6b   : > { %p1472_p3 = scmp.lt.s32.totalorder %s1463_s3, %s1463_s3 }
  0x6c   : > { %p1466_p9 = pnand %p1464_p0, %p2056_p5 }
  0x6d   : > { %p1473_p7 = por %p1472_p3, %p1471_p4 }
  0x6e   : > { %p1467_p2 = pneg %p1466_p9 }
  0x70   : > { %p1474_p10 = pnand %p1473_p7, %p1467_p2 }
  0x72   : > { %1477 = shalt.err (!%p1474_p10)
}
  0x73   : > { %s2057_s15 = smov 8   ;;  %s2058_s26 = smov 128  }
  0x74   : > { %1217 = dma.hbm_to_vmem [thread:$0]  (!%p2054_p13), %s2011_s5, 4096, %s267_s16, [#allocation10], %s2058_s26, %s2058_s26, %s2057_s15  }
  0x75   : > { %s1194_s10 = sshll.u32 %s1624_s28, 7  ;;  %s287_s17 = scalar_lea.vmem [#allocation3], %s1110_s29 }
  0x76   : > { %s296_s12 = sshll.u32 %s287_s17, 4  ;;  %s1867_s3 = scalar_lea.hbm %s2006_s0, %s1194_s10  ;;  %s297_s12 = int_to_ptr.vmem [resolvable:$true] %s296_s12 }
  0x77   : > { %s284_s14 = scalar_lea.sflag [#allocation4], %s1783_s21  ;;  %s1478_s7 = scalar_lea.hbm %s1867_s3, 128 }
  0x78   : > { %p1479_p3 = scmp.ne.s32.totalorder %s1867_s3, %s1478_s7  ;;  %p2059_p7 = scmp.ne.s32.totalorder %s2053_s8, 0 }
  0x79   : > { %s1483_s29 = scalar_lea.hbm %s2006_s0, 256  ;;  %p1484_p13 = scmp.lt.u32.totalorder %s1867_s3, %s2006_s0 }
  0x7a   : > { %p1481_p11 = pnand %p1479_p3, %p2059_p7  ;;  %p1485_p6 = scmp.lt.u32.totalorder %s1483_s29, %s1478_s7 }
  0x7b   : > { %p1487_p12 = scmp.lt.u32.totalorder %s1478_s7, %s1867_s3 }
  0x7c   : > { %p1482_p1 = pneg %p1481_p11  ;;  %p1486_p8 = por %p1485_p6, %p1484_p13 }
  0x7e   : > { %p1488_p0 = por %p1487_p12, %p1486_p8 }
  0x80   : > { %p1489_p5 = pnand %p1488_p0, %p1482_p1 }
  0x82   : > { %1492 = shalt.err (!%p1489_p5)
}
  0x83   : > { %s1493_s24 = scalar_lea.vmem %s297_s12, 128  ;;  %s1635_s10 = smov [#allocation3]  }
  0x84   : > { %p1494_p9 = scmp.ne.s32.totalorder %s297_s12, %s1493_s24  ;;  %s1498_s17 = sshll.u32 %s1635_s10, 4  ;;  %s1499_s17 = int_to_ptr.vmem [resolvable:$false] %s1498_s17 }
  0x85   : > { %s1500_s22 = scalar_lea.vmem %s1499_s17, 256  ;;  %p1501_p10 = scmp.lt.s32.totalorder %s297_s12, %s1499_s17 }
  0x86   : > { %p1496_p2 = pnand %p1494_p9, %p2059_p7  ;;  %p1502_p3 = scmp.lt.s32.totalorder %s1500_s22, %s1493_s24 }
  0x88   : > { %p1497_p4 = pneg %p1496_p2  ;;  %p1503_p11 = por %p1502_p3, %p1501_p10 }
  0x8a   : > { %p1504_p6 = pnand %p1503_p11, %p1497_p4 }
  0x8c   : > { %1507 = shalt.err (!%p1504_p6)
}
  0x8d   : > { %p2060_p13 = scmp.ne.s32.totalorder %s2050_s13, 0  ;;  %s2061_s7 = sshll.u32 %s1783_s21, 2 }
  0x8e   : > { %s326_s20 = scalar_lea.vmem [#allocation8], %s2061_s7  ;;  %s1508_s15 = scalar_lea.hbm %s1807_s18, 64 }
  0x8f   : > { %1221 = dma.hbm_to_vmem [thread:$0]  (!%p2060_p13), %s1867_s3, 128, %s297_s12, %s284_s14  }
  0x90   : > { %s334_s16 = sshll.u32 %s326_s20, 4  ;;  %p1509_p1 = scmp.ne.s32.totalorder %s1807_s18, %s1508_s15  ;;  %s335_s16 = int_to_ptr.vmem [resolvable:$true] %s334_s16 }
  0x91   : > { %s1513_s1 = scalar_lea.hbm %s2008_s2, 128  ;;  %p1514_p0 = scmp.lt.u32.totalorder %s1807_s18, %s2008_s2 }
  0x92   : > { %p1511_p8 = pnand %p1509_p1, %p2059_p7  ;;  %p1515_p5 = scmp.lt.u32.totalorder %s1513_s1, %s1508_s15 }
  0x93   : > { %p1517_p2 = scmp.lt.u32.totalorder %s1508_s15, %s1807_s18 }
  0x94   : > { %p1512_p12 = pneg %p1511_p8  ;;  %p1516_p9 = por %p1515_p5, %p1514_p0 }
  0x96   : > { %p1518_p4 = por %p1517_p2, %p1516_p9 }
  0x98   : > { %p1519_p10 = pnand %p1518_p4, %p1512_p12 }
  0x9a   : > { %1522 = shalt.err (!%p1519_p10)
}
  0x9b   : > { %s1523_s21 = scalar_lea.vmem %s335_s16, 64  ;;  %s1636_s12 = smov [#allocation8]  }
  0x9c   : > { %p1524_p3 = scmp.ne.s32.totalorder %s335_s16, %s1523_s21  ;;  %s1528_s3 = sshll.u32 %s1636_s12, 4  ;;  %s1529_s3 = int_to_ptr.vmem [resolvable:$false] %s1528_s3 }
  0x9d   : > { %s1530_s14 = scalar_lea.vmem %s1529_s3, 128  ;;  %p1531_p1 = scmp.lt.s32.totalorder %s335_s16, %s1529_s3 }
  0x9e   : > { %p1526_p11 = pnand %p1524_p3, %p2059_p7  ;;  %p1532_p8 = scmp.lt.s32.totalorder %s1530_s14, %s1523_s21 }
  0xa0   : > { %p1527_p6 = pneg %p1526_p11  ;;  %p1533_p13 = por %p1532_p8, %p1531_p1 }
  0xa2   : > { %p1534_p0 = pnand %p1533_p13, %p1527_p6 }
  0xa4   : > { %1537 = shalt.err (!%p1534_p0)
}
  0xa5   : > { %p2062_p5 = scmp.ne.s32.totalorder %s2050_s13, 0  ;;  %p2063_p12 = scmp.ne.s32.totalorder %s2044_s11, 0 }
  0xa6   : > { %s1910_s8 = sand.u32 (!%p2063_p12), 1, %s1612_s25   ;;  %p2064_p7 = scmp.ne.s32.totalorder (!%p2063_p12), %s2041_s9, 0 }
  0xa7   : > { %1227 = dma.hbm_to_vmem [thread:$0]  (!%p2062_p5), %s1807_s18, 64, %s335_s16, %s1809_s23  }
  0xa8   : > { %343 = sbr.rel (%p2063_p12) target bundleno = 726 (0x2d6), region = 48  ;;  %s1118_s17 = sshll.u32 (!%p2063_p12), %s1910_s8, 3 }
  0xa9   : > { %s346_s22 = scalar_lea.sflag (!%p2063_p12), [#allocation4], %s1910_s8  ;;  %s1916_s7 = scalar_lea.vmem (!%p2063_p12), [#allocation3], %s1118_s17 }
  0xaf   : > { %1591 = dma.done.wait (%p2064_p7), %s346_s22, 128  }
  0xb0   : > { %1593 = vsyncadd (%p2064_p7), %s346_s22, 4294967168  ;;  %s354_s11 = sand.u32 1, %s1709_s30   ;;  %s1119_s13 = sshll.u32 %s1910_s8, 2 }
  0xb1   : > { %s355_s23 = scalar_lea.sflag [#allocation7], %s354_s11  ;;  %s1924_s18 = scalar_lea.vmem [#allocation6], %s1119_s13 }
  0xb2   : > { %1595 = dma.done.wait (%p2064_p7), %s355_s23, 128  }
  0xb3   : > { %1597 = vsyncadd (%p2064_p7), %s355_s23, 4294967168  ;;  %s1930_s20 = scalar_lea.vmem [#allocation8], %s1119_s13  ;;  %p2065_p13 = scmp.eq.s32.totalorder %s1709_s30, 0 }
  0xb5   : > { %1599 = dma.done.wait (%p2065_p13), [#allocation10], 8192   ;;  %p2066_p9 = pmov %p2065_p13 }
  0xb6   : > { %v1290_v0 = vld [vmem:[#allocation9 + $0x4] ss:$8 sps:$4 sm:$0xff]   ;;  %v1292_v1 = vld [vmem:[#allocation9] ss:$8 sps:$4 sm:$0xff]   ;;  %v1293_v2 = vld [vmem:[#allocation9 + $0x14] ss:$8 sps:$4 sm:$0xff]  }
  0xb7   : > { %1601 = vsyncadd (%p2066_p9), [#allocation10], 4294959104  ;;  %636 = vmatprep.subr.bf16.mxu0 %v1290_v0  ;;  %v1295_v3 = vld [vmem:[#allocation9 + $0x10] ss:$8 sps:$4 sm:$0xff]   ;;  %v1296_v4 = vld [vmem:[#allocation9 + $0x24] ss:$8 sps:$4 sm:$0xff]  }
  0xb8   : > { %637 = vmatpush1.bf16.msra.mxu0 %v1292_v1  ;;  %v1298_v5 = vld [vmem:[#allocation9 + $0x20] ss:$8 sps:$4 sm:$0xff]   ;;  %v1299_v6 = vld [vmem:[#allocation9 + $0x34] ss:$8 sps:$4 sm:$0xff]   ;;  %v1301_v7 = vld [vmem:[#allocation9 + $0x30] ss:$8 sps:$4 sm:$0xff]  }
  0xb9   : > { %638 = vmatprep.subr.bf16.mxu0 %v1293_v2  ;;  %v1302_v8 = vld [vmem:[#allocation9 + $0x44] ss:$8 sps:$4 sm:$0xff]   ;;  %v1304_v9 = vld [vmem:[#allocation9 + $0x40] ss:$8 sps:$4 sm:$0xff]   ;;  %v1305_v10 = vld [vmem:[#allocation9 + $0x54] ss:$8 sps:$4 sm:$0xff]  }
  0xba   : > { %v1307_v11 = vld [vmem:[#allocation9 + $0x50] ss:$8 sps:$4 sm:$0xff]   ;;  %v1308_v12 = vld [vmem:[#allocation9 + $0x64] ss:$8 sps:$4 sm:$0xff]   ;;  %v1310_v13 = vld [vmem:[#allocation9 + $0x60] ss:$8 sps:$4 sm:$0xff]  }
  0xbb   : > { %v1937_v14 = vld [vmem:[%s1916_s7] sm:$0xff]  ;;  %v1343_v18 = vld [vmem:[#allocation11 + $0x14] ss:$8 sps:$4 sm:$0xff]   ;;  %v1313_v20 = vld [vmem:[#allocation9 + $0x70] ss:$8 sps:$4 sm:$0xff]   ;;  %s1191_s29 = sshll.u32 %s1620_s27, 7 }
  0xbc   : > { %639 = vmatpush1.bf16.msra.mxu0 %v1295_v3  ;;  %v1125_v15 = vcombine.high %v1937_v14, %v1937_v14  ;;  %v1340_v16 = vld [vmem:[#allocation11 + $0x4] ss:$8 sps:$4 sm:$0xff]   ;;  %v1342_v17 = vld [vmem:[#allocation11] ss:$8 sps:$4 sm:$0xff]   ;;  %v1311_v19 = vld [vmem:[#allocation9 + $0x74] ss:$8 sps:$4 sm:$0xff]   ;;  %v1124_v55 = vcombine.low %v1937_v14, %v1937_v14  ;;  %v459_v3 = vlaneseq }
  0xbd   : > { %640 = vmatprep.subr.bf16.mxu0 %v1296_v4  ;;  %885 = vmatprep.subr.bf16.mxu1 %v1340_v16  ;;  %v1345_v21 = vld [vmem:[#allocation11 + $0x10] ss:$8 sps:$4 sm:$0xff]   ;;  %v1346_v22 = vld [vmem:[#allocation11 + $0x24] ss:$8 sps:$4 sm:$0xff]   ;;  %v1316_v24 = vld [vmem:[#allocation9 + $0x80] ss:$8 sps:$4 sm:$0xff]  }
  0xbe   : > { %668 = vmatprep.mubr.bf16.mxu0 %v1125_v15  ;;  %886 = vmatpush1.bf16.msra.mxu1 %v1342_v17  ;;  %v1314_v23 = vld [vmem:[#allocation9 + $0x84] ss:$8 sps:$4 sm:$0xff]   ;;  %v1348_v25 = vld [vmem:[#allocation11 + $0x20] ss:$8 sps:$4 sm:$0xff]   ;;  %v1349_v26 = vld [vmem:[#allocation11 + $0x34] ss:$8 sps:$4 sm:$0xff]  }
  0xbf   : > { %887 = vmatprep.subr.bf16.mxu1 %v1343_v18  ;;  %v1317_v27 = vld [vmem:[#allocation9 + $0x94] ss:$8 sps:$4 sm:$0xff]   ;;  %v1319_v28 = vld [vmem:[#allocation9 + $0x90] ss:$8 sps:$4 sm:$0xff]   ;;  %v1352_v30 = vld [vmem:[#allocation11 + $0x44] ss:$8 sps:$4 sm:$0xff]  }
  0xc0   : > { %641 = vmatpush1.bf16.msra.mxu0 %v1298_v5  ;;  %v1351_v29 = vld [vmem:[#allocation11 + $0x30] ss:$8 sps:$4 sm:$0xff]   ;;  %v1320_v31 = vld [vmem:[#allocation9 + $0xa4] ss:$8 sps:$4 sm:$0xff]   ;;  %v1322_v32 = vld [vmem:[#allocation9 + $0xa0] ss:$8 sps:$4 sm:$0xff]  }
  0xc1   : > { %642 = vmatprep.subr.bf16.mxu0 %v1299_v6  ;;  %v1354_v33 = vld [vmem:[#allocation11 + $0x40] ss:$8 sps:$4 sm:$0xff]   ;;  %v1355_v34 = vld [vmem:[#allocation11 + $0x54] ss:$8 sps:$4 sm:$0xff]   ;;  %v1357_v36 = vld [vmem:[#allocation11 + $0x50] ss:$8 sps:$4 sm:$0xff]  }
  0xc2   : > { %888 = vmatpush1.bf16.msra.mxu1 %v1345_v21  ;;  %v1323_v35 = vld [vmem:[#allocation9 + $0xb4] ss:$8 sps:$4 sm:$0xff]   ;;  %v1325_v37 = vld [vmem:[#allocation9 + $0xb0] ss:$8 sps:$4 sm:$0xff]   ;;  %v1358_v38 = vld [vmem:[#allocation11 + $0x64] ss:$8 sps:$4 sm:$0xff]  }
  0xc3   : > { %889 = vmatprep.subr.bf16.mxu1 %v1346_v22  ;;  %v1326_v39 = vld [vmem:[#allocation9 + $0xc4] ss:$8 sps:$4 sm:$0xff]   ;;  %v1360_v40 = vld [vmem:[#allocation11 + $0x60] ss:$8 sps:$4 sm:$0xff]   ;;  %v1361_v42 = vld [vmem:[#allocation11 + $0x74] ss:$8 sps:$4 sm:$0xff]  }
  0xc4   : > { %643 = vmatpush1.bf16.msra.mxu0 %v1301_v7  ;;  %v1328_v41 = vld [vmem:[#allocation9 + $0xc0] ss:$8 sps:$4 sm:$0xff]   ;;  %v1329_v43 = vld [vmem:[#allocation9 + $0xd4] ss:$8 sps:$4 sm:$0xff]   ;;  %v1363_v44 = vld [vmem:[#allocation11 + $0x70] ss:$8 sps:$4 sm:$0xff]  }
  0xc5   : > { %644 = vmatprep.subr.bf16.mxu0 %v1302_v8  ;;  %v1331_v45 = vld [vmem:[#allocation9 + $0xd0] ss:$8 sps:$4 sm:$0xff]   ;;  %v1364_v46 = vld [vmem:[#allocation11 + $0x84] ss:$8 sps:$4 sm:$0xff]   ;;  %v1366_v48 = vld [vmem:[#allocation11 + $0x80] ss:$8 sps:$4 sm:$0xff]  }
  0xc6   : > { %890 = vmatpush1.bf16.msra.mxu1 %v1348_v25  ;;  %v1332_v47 = vld [vmem:[#allocation9 + $0xe4] ss:$8 sps:$4 sm:$0xff]   ;;  %v1334_v49 = vld [vmem:[#allocation9 + $0xe0] ss:$8 sps:$4 sm:$0xff]   ;;  %v1367_v50 = vld [vmem:[#allocation11 + $0x94] ss:$8 sps:$4 sm:$0xff]  }
  0xc7   : > { %891 = vmatprep.subr.bf16.mxu1 %v1349_v26  ;;  %v1335_v51 = vld [vmem:[#allocation9 + $0xf4] ss:$8 sps:$4 sm:$0xff]   ;;  %v1369_v52 = vld [vmem:[#allocation11 + $0x90] ss:$8 sps:$4 sm:$0xff]   ;;  %v1370_v54 = vld [vmem:[#allocation11 + $0xa4] ss:$8 sps:$4 sm:$0xff]  }
  0xc8   : > { %645 = vmatpush1.bf16.msra.mxu0 %v1304_v9  ;;  %v1337_v53 = vld [vmem:[#allocation9 + $0xf0] ss:$8 sps:$4 sm:$0xff]   ;;  %v1372_v56 = vld [vmem:[#allocation11 + $0xa0] ss:$8 sps:$4 sm:$0xff]   ;;  %v1373_v57 = vld [vmem:[#allocation11 + $0xb4] ss:$8 sps:$4 sm:$0xff]  }
  0xc9   : > { %646 = vmatprep.subr.bf16.mxu0 %v1305_v10  ;;  %v1375_v58 = vld [vmem:[#allocation11 + $0xb0] ss:$8 sps:$4 sm:$0xff]   ;;  %v1376_v59 = vld [vmem:[#allocation11 + $0xc4] ss:$8 sps:$4 sm:$0xff]   ;;  %v1378_v60 = vld [vmem:[#allocation11 + $0xc0] ss:$8 sps:$4 sm:$0xff]  }
  0xca   : > { %892 = vmatpush1.bf16.msra.mxu1 %v1351_v29  ;;  %v1379_v61 = vld [vmem:[#allocation11 + $0xd4] ss:$8 sps:$4 sm:$0xff]   ;;  %v1381_v62 = vld [vmem:[#allocation11 + $0xd0] ss:$8 sps:$4 sm:$0xff]   ;;  %v1382_v63 = vld [vmem:[#allocation11 + $0xe4] ss:$8 sps:$4 sm:$0xff]  }
  0xcb   : > { %893 = vmatprep.subr.bf16.mxu1 %v1352_v30  ;;  %v1384_v0 = vld [vmem:[#allocation11 + $0xe0] ss:$8 sps:$4 sm:$0xff]   ;;  %v1385_v1 = vld [vmem:[#allocation11 + $0xf4] ss:$8 sps:$4 sm:$0xff]   ;;  %v1387_v2 = vld [vmem:[#allocation11 + $0xf0] ss:$8 sps:$4 sm:$0xff]  }
  0xcc   : > { %647 = vmatpush1.bf16.msra.mxu0 %v1307_v11  ;;  %v460_v4 = vshrl.u32 %v459_v3, 7  ;;  %v457_v6 = vld [vmem:[%s2010_s4] sm:$0x3]  ;;  %s415_s26 = scalar_lea.vmem [#allocation12], %s1118_s17  ;;  %s2067_s21 = sld [smem:[#allocation25_spill]] }
  0xcd   : > { %648 = vmatprep.subr.bf16.mxu0 %v1308_v12  ;;  %s961_s1 = sshll.u32 %s415_s26, 4  ;;  %s948_s3 = scalar_lea.sflag [#allocation5], %s1910_s8  ;;  %s1959_s1 = int_to_ptr.vmem [resolvable:$true] %s961_s1 }
  0xce   : > { %894 = vmatpush1.bf16.msra.mxu1 %v1354_v33  ;;  %v461_v5 = vsub.s32 0, %v460_v4  ;;  %v465_v7 = vsub.s32 1, %v460_v4  ;;  %v930_v33 = vld [vmem:[%s1924_s18] sm:$0xf]  ;;  %s1538_s14 = scalar_lea.vmem %s1959_s1, 128  ;;  %p2068_p4 = scmp.ne.s32.totalorder %s2049_s19, 0 }
  0xcf   : > { %895 = vmatprep.subr.bf16.mxu1 %v1355_v34  ;;  %p1539_p2 = scmp.ne.s32.totalorder %s1959_s1, %s1538_s14  ;;  %s1637_s27 = smov [#allocation12]  }
  0xd0   : > { %649 = vmatpush1.bf16.msra.mxu0 %v1310_v13  ;;  %v462_v8 = vrot.slane %v457_v6, %v461_v5  ;;  %v466_v9 = vrot.slane %v457_v6, %v465_v7  ;;  %s1542_s17 = sshll.u32 %s1637_s27, 4  ;;  %s1543_s17 = int_to_ptr.vmem [resolvable:$false] %s1542_s17 }
  0xd1   : > { %650 = vmatprep.subr.bf16.mxu0 %v1311_v19  ;;  %p1540_p10 = pnand %p1539_p2, %p2068_p4  ;;  %s1544_s22 = scalar_lea.vmem %s1543_s17, 256 }
  0xd2   : > { %896 = vmatpush1.bf16.msra.mxu1 %v1357_v36  ;;  %v931_v36 = vunpack.c.l.bf16 %v930_v33  ;;  %s1957_s12 = scalar_lea.hbm %s2067_s21, %s1191_s29  ;;  %p1545_p11 = scmp.lt.s32.totalorder %s1959_s1, %s1543_s17 }
  0xd3   : > { %897 = vmatprep.subr.bf16.mxu1 %v1358_v38  ;;  %p1541_p3 = pneg %p1540_p10  ;;  %p1546_p6 = scmp.lt.s32.totalorder %s1544_s22, %s1538_s14 }
  0xd4   : > { %651 = vmatpush1.bf16.msra.mxu0 %v1313_v20  ;;  %v713_v20 = vld [vmem:[%s2012_s6] sm:$0x3] }
  0xd5   : > { %652 = vmatprep.subr.bf16.mxu0 %v1314_v23  ;;  %v722_v21 = vrot.slane %v713_v20, %v465_v7  ;;  %v718_v30 = vrot.slane %v713_v20, %v461_v5  ;;  %p1547_p1 = por %p1546_p6, %p1545_p11 }
  0xd6   : > { %898 = vmatpush1.bf16.msra.mxu1 %v1360_v40 }
  0xd7   : > { %899 = vmatprep.subr.bf16.mxu1 %v1361_v42  ;;  %p1548_p8 = pnand %p1547_p1, %p1541_p3 }
  0xd8   : > { %653 = vmatpush1.bf16.msra.mxu0 %v1316_v24 }
  0xd9   : > { %654 = vmatprep.subr.bf16.mxu0 %v1317_v27 }
  0xda   : > { %900 = vmatpush1.bf16.msra.mxu1 %v1363_v44 }
  0xdb   : > { %901 = vmatprep.subr.bf16.mxu1 %v1364_v46 }
  0xdc   : > { %655 = vmatpush1.bf16.msra.mxu0 %v1319_v28 }
  0xdd   : > { %656 = vmatprep.subr.bf16.mxu0 %v1320_v31 }
  0xde   : > { %902 = vmatpush1.bf16.msra.mxu1 %v1366_v48 }
  0xdf   : > { %903 = vmatprep.subr.bf16.mxu1 %v1367_v50 }
  0xe0   : > { %657 = vmatpush1.bf16.msra.mxu0 %v1322_v32  ;;  %v932_v32 = vld [vmem:[%s1930_s20] sm:$0xf] }
  0xe1   : > { %658 = vmatprep.subr.bf16.mxu0 %v1323_v35  ;;  %v933_v34 = vunpack.c.l.bf16 %v932_v32 }
  0xe2   : > { %904 = vmatpush1.bf16.msra.mxu1 %v1369_v52 }
  0xe3   : > { %905 = vmatprep.subr.bf16.mxu1 %v1370_v54 }
  0xe4   : > { %659 = vmatpush1.bf16.msra.mxu0 %v1325_v37 }
  0xe5   : > { %660 = vmatprep.subr.bf16.mxu0 %v1326_v39 }
  0xe6   : > { %906 = vmatpush1.bf16.msra.mxu1 %v1372_v56 }
  0xe7   : > { %907 = vmatprep.subr.bf16.mxu1 %v1373_v57 }
  0xe8   : > { %661 = vmatpush1.bf16.msra.mxu0 %v1328_v41 }
  0xe9   : > { %662 = vmatprep.subr.bf16.mxu0 %v1329_v43 }
  0xea   : > { %908 = vmatpush1.bf16.msra.mxu1 %v1375_v58 }
  0xeb   : > { %909 = vmatprep.subr.bf16.mxu1 %v1376_v59 }
  0xec   : > { %663 = vmatpush1.bf16.msra.mxu0 %v1331_v45 }
  0xed   : > { %664 = vmatprep.subr.bf16.mxu0 %v1332_v47 }
  0xee   : > { %910 = vmatpush1.bf16.msra.mxu1 %v1378_v60 }
  0xef   : > { %911 = vmatprep.subr.bf16.mxu1 %v1379_v61 }
  0xf0   : > { %665 = vmatpush1.bf16.msra.mxu0 %v1334_v49 }
  0xf1   : > { %666 = vmatprep.subr.bf16.mxu0 %v1335_v51 }
  0xf2   : > { %912 = vmatpush1.bf16.msra.mxu1 %v1381_v62 }
  0xf3   : > { %913 = vmatprep.subr.bf16.mxu1 %v1382_v63 }
  0xf4   : > { %667 = vmatpush1.bf16.msra.mxu0 %v1337_v53 }
  0xf6   : > { %914 = vmatpush1.bf16.msra.mxu1 %v1384_v0 }
  0xf7   : > { %669 = vmatmul.mubr.bf16.vlgmr.msra.gmra.mrb[0].mxu0 %v1124_v55  ;;  %915 = vmatprep.subr.bf16.mxu1 %v1385_v1 }
  0xfa   : > { %916 = vmatpush1.bf16.msra.mxu1 %v1387_v2 }
 0x1ca   : > { %v670_v10 = vpop.f32.mrb[0].mxu0 }
 0x1cb   : > { %v671_v11 = vadd.f32 %v670_v10, %v462_v8  ;;  %v672_v12 = vpop.f32.mrb[1].mxu0 }
 0x1cc   : > { %v673_v13 = vadd.f32 %v672_v12, %v466_v9  ;;  %v674_v14 = vpop.f32.mrb[2].mxu0 }
 0x1cd   : > { %v677_v15 = vmax.f32 %v671_v11, 0.0  ;;  %v675_v16 = vpop.f32.mrb[3].mxu0 }
 0x1ce   : > { %v678_v17 = vmax.f32 %v673_v13, 0.0 }
 0x1cf   : > { %v679_v19 = vpack.c.bf16 %v677_v15, %v677_v15 }
 0x1d0   : > { %v680_v18 = vpack.c.bf16 %v678_v17, %v678_v17 }
 0x1d2   : > { %917 = vmatprep.mubr.bf16.mxu1 %v680_v18 }
 0x1d3   : > { %918 = vmatmul.mubr.bf16.vlgmr.msra.gmra.mrb[0].mxu1 %v679_v19 }
 0x2a6   : > { %v919_v22 = vpop.f32.mrb[0].mxu1 }
 0x2a7   : > { %v921_v23 = vpop.f32.mrb[1].mxu1  ;;  %v920_v31 = vadd.f32 %v919_v22, %v718_v30 }
 0x2a8   : > { %v922_v24 = vadd.f32 %v921_v23, %v722_v21  ;;  %v923_v25 = vpop.f32.mrb[2].mxu1 }
 0x2a9   : > { %v924_v26 = vpop.f32.mrb[3].mxu1  ;;  %v935_v35 = vmul.f32 2.0, %v920_v31 }
 0x2aa   : > { %1388 = vtanh.f32 %v922_v24 }
 0x2ab   : > { %v936_v38 = vsub.f32 %v935_v35, %v933_v34 }
 0x2b4   : > { %v1389_v27 = vpop.eup %1388 }
 0x2b5   : > { %v927_v28 = vsub.f32 0.0, %v1389_v27 }
 0x2b7   : > { %v928_v29 = vmul.f32 1.442695, %v927_v28 }
 0x2b9   : > { %1390 = vpow2.f32 %v928_v29 }
 0x2c3   : > { %v1391_v37 = vpop.eup %1390 }
 0x2c4   : > { %v934_v39 = vmul.f32 %v1391_v37, %v931_v36 }
 0x2c6   : > { %v937_v40 = vmul.f32 %v936_v38, %v934_v39 }
 0x2c8   : > { %946 = vst [vmem:[%s415_s26] sm:$0xff] %v937_v40 }
 0x2c9   : > { %1551 = shalt.err (!%p1548_p8)
}
 0x2ca   : > { %s1552_s8 = scalar_lea.hbm %s1957_s12, 128  ;;  %s1556_s13 = scalar_lea.hbm %s2067_s21, 256 }
 0x2cb   : > { %p1553_p0 = scmp.ne.s32.totalorder %s1957_s12, %s1552_s8  ;;  %p1557_p7 = scmp.lt.u32.totalorder %s1957_s12, %s2067_s21 }
 0x2cc   : > { %p1558_p13 = scmp.lt.u32.totalorder %s1556_s13, %s1552_s8  ;;  %p1560_p2 = scmp.lt.u32.totalorder %s1552_s8, %s1957_s12 }
 0x2cd   : > { %p1554_p5 = pnand %p1553_p0, %p2068_p4 }
 0x2ce   : > { %p1559_p9 = por %p1558_p13, %p1557_p7 }
 0x2cf   : > { %p1555_p12 = pneg %p1554_p5 }
 0x2d0   : > { %p1561_p10 = por %p1560_p2, %p1559_p9 }
 0x2d2   : > { %p1562_p3 = pnand %p1561_p10, %p1555_p12 }
 0x2d4   : > { %1565 = shalt.err (!%p1562_p3)
}
 0x2d5   : > { %1209 = dma.vmem_to_hbm [thread:$0]  (%p2068_p4), %s1959_s1, 128, %s1957_s12, %s948_s3  }
 0x2d6 PF: > { %s2069_s20 = sld [smem:[#allocation17_spill]]  ;;  %s2070_s30 = sld [smem:[#allocation20_spill]] }
 0x2d7   : > { %s2071_s9 = sld [smem:[#allocation19_spill]] }
 0x2dc   : > { %s973_s16 = sand.u32 1, %s2069_s20   ;;  %p2072_p11 = scmp.ne.s32.totalorder %s2070_s30, 0 }
 0x2dd   : > { %p2073_p6 = scmp.ge.s32.totalorder %s2071_s9, 2  ;;  %s974_s15 = scalar_lea.sflag [#allocation5], %s973_s16 }
 0x2df   : > { %p1229_p1 = pnand %p2073_p6, %p2072_p11 }
 0x2e1   : > { %1603 = dma.done.wait (!%p1229_p1), %s974_s15, 128  }
 0x2e2   : > { %1605 = vsyncadd (!%p1229_p1), %s974_s15, 4294967168  ;;  %s27_s29 = sadd.s32 1, %s2071_s9   ;;  %s2074_s26 = sld [smem:[#allocation18_spill]] }
 0x2e3   : > { %p24_p8 = scmp.ge.s32.totalorder %s27_s29, 4   ;;  %s2075_s19 = sld [smem:[#allocation22_spill]] }
 0x2e4   : > { %s2076_s10 = sld [smem:[#allocation21_spill]]  ;;  %s2077_s24 = smov %s1612_s25 }
 0x2e5   : > { %s2080_s27 = smov %s1624_s28  ;;  %26 = sbr.rel (!%p24_p8) target bundleno = 13 (0xd), region = 133 }
 0x2e8   : > { %s2078_s25 = smov %s2074_s26 }
 0x2e9   : > { %s2079_s26 = smov %s2075_s19 }
 0x2ea   : > { %s2081_s28 = smov %s2076_s10 }
 0x2ec   :  { %979 = vsyncpa [#allocation4], 1 }
 0x2ed   :  { %981 = vsyncpa [#allocation4 + $0x1], 1 }
 0x2ee   :  { %982 = vsyncpa [#allocation7], 1 }
 0x2ef   :  { %984 = vsyncpa [#allocation7 + $0x1], 1 }
 0x2f0   :  { %985 = vsyncpa [#allocation10], 1 }
 0x2f1   :  { %986 = vsyncpa [#allocation5], 1 }
 0x2f2   :  { %988 = vsyncpa [#allocation5 + $0x1], 1 }

</bundles_post_ra>
